<compile_context>
chip_gen: v7x
topology: tpu7x:2x2x1
jax: 0.10.0
libtpu: 0.0.40
codegen_flags: <defaults>
</compile_context>

<pallas_src>
import functools

import jax
import jax.numpy as jnp
from jax.experimental import pallas as pl
from jax.experimental.pallas import tpu as pltpu


def _round_up(x, m):
    return (x + m - 1) // m * m


def _dot_product_bias_kernel(uid_ref, mid_ref,          # scalar-prefetch (SMEM)
                             uf_hbm, mf_hbm,            # fused tables, HBM (pl.ANY)
                             o_ref,                     # (1, TILE_B) output block
                             ubuf, mbuf, sems,          # scratch
                             *, tile_b, low, high):
    t = pl.program_id(0)
    base = t * tile_b

    # Issue all row-gather DMAs for this batch tile (users + movies) so they
    # overlap each other, then drain them.
    @pl.loop(0, tile_b)
    def _(r):
        u = uid_ref[base + r]
        m = mid_ref[base + r]
        pltpu.make_async_copy(uf_hbm.at[u], ubuf.at[r], sems.at[0]).start()
        pltpu.make_async_copy(mf_hbm.at[m], mbuf.at[r], sems.at[1]).start()

    @pl.loop(0, tile_b)
    def _(r):
        # Waits only need a matching shape + semaphore; refs below are dummies.
        pltpu.make_async_copy(uf_hbm.at[0], ubuf.at[0], sems.at[0]).wait()
        pltpu.make_async_copy(mf_hbm.at[0], mbuf.at[0], sems.at[1]).wait()

    # Fused tables: row-wise multiply + reduce == dot(u, m) + b_u + b_m.
    prod = ubuf[...] * mbuf[...]               # (tile_b, f_pad) f32
    res = jnp.sum(prod, axis=1)                # (tile_b,)
    scaled = jax.nn.sigmoid(res) * (high - low) + low   # sigmoid_range
    o_ref[...] = scaled.reshape(1, tile_b)     # lane-dense store


def dot_product_bias(x, user_factors, user_bias, movie_factors, movie_bias,
                     y_range=(0.0, 10.5), tile_b=256):
    """Pallas forward pass matching DotProductBias.forward.

    x: (B, 2) int — column 0 = user index, column 1 = item index.
    Returns (B,) float32.
    """
    B = x.shape[0]
    n_users, nf = user_factors.shape
    n_items = movie_factors.shape[0]
    low, high = float(y_range[0]), float(y_range[1])

    # --- Fuse biases into the factor tables (wrapper-side, one-time prep). ---
    #   uf_aug = [uf | ub | 1],  mf_aug = [mf | 1 | mb]   ->  F_aug = nf + 2
    f_aug = nf + 2
    f_pad = max(8, _round_up(f_aug, 8))  # pad feature dim; zero columns are inert
    uf_aug = jnp.zeros((n_users, f_pad), jnp.float32)
    uf_aug = uf_aug.at[:, :nf].set(user_factors.astype(jnp.float32))
    uf_aug = uf_aug.at[:, nf].set(user_bias.astype(jnp.float32))
    uf_aug = uf_aug.at[:, nf + 1].set(1.0)
    mf_aug = jnp.zeros((n_items, f_pad), jnp.float32)
    mf_aug = mf_aug.at[:, :nf].set(movie_factors.astype(jnp.float32))
    mf_aug = mf_aug.at[:, nf].set(1.0)
    mf_aug = mf_aug.at[:, nf + 1].set(movie_bias.astype(jnp.float32))

    # --- Batch tiling: single tile for small B, 128-aligned tiles otherwise. ---
    if B <= tile_b:
        tb = max(8, _round_up(B, 8))
    else:
        tb = _round_up(tile_b, 128)        # lane-dense output blocks
    b_pad = _round_up(B, tb)

    # Indices go to SMEM via scalar prefetch; pad with index 0 (valid row).
    uid = jnp.zeros((b_pad,), jnp.int32).at[:B].set(x[:, 0].astype(jnp.int32))
    mid = jnp.zeros((b_pad,), jnp.int32).at[:B].set(x[:, 1].astype(jnp.int32))

    kernel = functools.partial(_dot_product_bias_kernel,
                               tile_b=tb, low=low, high=high)

    out = pl.pallas_call(
        kernel,
        out_shape=jax.ShapeDtypeStruct((1, b_pad), jnp.float32),
        grid_spec=pltpu.PrefetchScalarGridSpec(
            num_scalar_prefetch=2,                 # uid, mid -> SMEM
            grid=(b_pad // tb,),
            in_specs=[
                pl.BlockSpec(memory_space=pl.ANY),  # user table stays in HBM
                pl.BlockSpec(memory_space=pl.ANY),  # movie table stays in HBM
            ],
            out_specs=pl.BlockSpec((1, tb), lambda t, uid, mid: (0, t)),
            scratch_shapes=[
                pltpu.VMEM((tb, f_pad), jnp.float32),   # gathered user rows
                pltpu.VMEM((tb, f_pad), jnp.float32),   # gathered movie rows
                pltpu.SemaphoreType.DMA((2,)),
            ],
        ),
        compiler_params=pltpu.CompilerParams(
            dimension_semantics=("parallel",),      # shard batch tiles on v7x
        ),
    )(uid, mid, uf_aug, mf_aug)

    return out[0, :B]


def _reference(x, uf, ub, mf, mb, y_range=(0.0, 10.5)):
    users = uf[x[:, 0]]
    movies = mf[x[:, 1]]
    res = (users * movies).sum(axis=1) + ub[x[:, 0]] + mb[x[:, 1]]
    low, high = y_range
    return jax.nn.sigmoid(res) * (high - low) + low


if __name__ == "__main__":
    # Small synthetic problem consistent with the module's __init__ shapes.
    n_users, n_animes, n_factors = 32, 48, 5
    batch = 8

    key = jax.random.PRNGKey(0)
    k_uf, k_ub, k_mf, k_mb, k_xu, k_xm = jax.random.split(key, 6)

    # create_params: zeros().normal_(0, 0.1)
    user_factors = 0.1 * jax.random.normal(k_uf, (n_users, n_factors), jnp.float32)
    user_bias = 0.1 * jax.random.normal(k_ub, (n_users,), jnp.float32)
    movie_factors = 0.1 * jax.random.normal(k_mf, (n_animes, n_factors), jnp.float32)
    movie_bias = 0.1 * jax.random.normal(k_mb, (n_animes,), jnp.float32)

    x = jnp.stack(
        [
            jax.random.randint(k_xu, (batch,), 0, n_users, jnp.int32),
            jax.random.randint(k_xm, (batch,), 0, n_animes, jnp.int32),
        ],
        axis=1,
    )  # (B, 2) int32

    out = dot_product_bias(x, user_factors, user_bias, movie_factors, movie_bias)
    out = jax.block_until_ready(out)

    ref = _reference(x, user_factors, user_bias, movie_factors, movie_bias)
    assert out.shape == (batch,)
    assert jnp.allclose(out, ref, atol=1e-5, rtol=1e-5), (out, ref)

    print("KERNEL_OK")
</pallas_src>

<mosaic_0001>
module attributes {stable_mosaic.version = 11 : i64} {
  func.func @_dot_product_bias_kernel(%arg0: i32, %arg1: memref<8xi32, #tpu.memory_space<smem>>, %arg2: memref<8xi32, #tpu.memory_space<smem>>, %arg3: memref<32x8xf32, #tpu.memory_space<any>>, %arg4: memref<48x8xf32, #tpu.memory_space<any>>, %arg5: memref<1x8xf32, #tpu.memory_space<vmem>>, %arg6: memref<8x8xf32, #tpu.memory_space<vmem>>, %arg7: memref<8x8xf32, #tpu.memory_space<vmem>>, %arg8: memref<2x!tpu.dma_semaphore, #tpu.memory_space<semaphore_mem>>) attributes {dimension_semantics = [#tpu.dimension_semantics<parallel>], iteration_bounds = array<i64: 1>, scalar_prefetch = 2 : i64, scratch_operands = 3 : i64, tpu.core_type = #tpu.core_type<tc>, window_params = [{}, {}, {transform_indices = @transform_2, window_bounds = array<i64: 1, 8>}]} {
    %c8_i32 = arith.constant 8 : i32
    %0 = arith.muli %arg0, %c8_i32 : i32
    %c0_i32 = arith.constant 0 : i32
    %c8_i32_0 = arith.constant 8 : i32
    %1 = arith.addi %c0_i32, %c8_i32_0 : i32
    %c1_i32 = arith.constant 1 : i32
    scf.for %arg9 = %c0_i32 to %1 step %c1_i32  : i32 {
      %c1_i32_13 = arith.constant 1 : i32
      %18 = arith.muli %arg9, %c1_i32_13 : i32
      %c0_i32_14 = arith.constant 0 : i32
      %19 = arith.addi %c0_i32_14, %18 : i32
      %20 = arith.addi %0, %19 : i32
      %21 = arith.index_cast %20 : i32 to index
      %22 = memref.load %arg1[%21] : memref<8xi32, #tpu.memory_space<smem>>
      %23 = arith.addi %0, %19 : i32
      %24 = arith.index_cast %23 : i32 to index
      %25 = memref.load %arg2[%24] : memref<8xi32, #tpu.memory_space<smem>>
      %c0_i32_15 = arith.constant 0 : i32
      %c0_i32_16 = arith.constant 0 : i32
      %26 = tpu.memref_slice %arg3[%22, %c0_i32_16] : memref<32x8xf32, #tpu.memory_space<any>> -> memref<1x8xf32, #tpu.memory_space<any>>
      %27 = tpu.memref_squeeze %26 : memref<1x8xf32, #tpu.memory_space<any>> -> memref<8xf32, #tpu.memory_space<any>>
      %c0_i32_17 = arith.constant 0 : i32
      %28 = tpu.memref_slice %arg6[%19, %c0_i32_17] : memref<8x8xf32, #tpu.memory_space<vmem>> -> memref<1x8xf32, #tpu.memory_space<vmem>>
      %29 = tpu.memref_squeeze %28 : memref<1x8xf32, #tpu.memory_space<vmem>> -> memref<8xf32, #tpu.memory_space<vmem>>
      %30 = tpu.memref_slice %arg8[%c0_i32_15] : memref<2x!tpu.dma_semaphore, #tpu.memory_space<semaphore_mem>> -> memref<1x!tpu.dma_semaphore, #tpu.memory_space<semaphore_mem>>
      %31 = tpu.memref_squeeze %30 : memref<1x!tpu.dma_semaphore, #tpu.memory_space<semaphore_mem>> -> memref<!tpu.dma_semaphore, #tpu.memory_space<semaphore_mem>>
      tpu.enqueue_dma source(%27 : memref<8xf32, #tpu.memory_space<any>>) target(%29 : memref<8xf32, #tpu.memory_space<vmem>>) target_semaphore(%31 : memref<!tpu.dma_semaphore, #tpu.memory_space<semaphore_mem>>)
      %c1_i32_18 = arith.constant 1 : i32
      %c0_i32_19 = arith.constant 0 : i32
      %32 = tpu.memref_slice %arg4[%25, %c0_i32_19] : memref<48x8xf32, #tpu.memory_space<any>> -> memref<1x8xf32, #tpu.memory_space<any>>
      %33 = tpu.memref_squeeze %32 : memref<1x8xf32, #tpu.memory_space<any>> -> memref<8xf32, #tpu.memory_space<any>>
      %c0_i32_20 = arith.constant 0 : i32
      %34 = tpu.memref_slice %arg7[%19, %c0_i32_20] : memref<8x8xf32, #tpu.memory_space<vmem>> -> memref<1x8xf32, #tpu.memory_space<vmem>>
      %35 = tpu.memref_squeeze %34 : memref<1x8xf32, #tpu.memory_space<vmem>> -> memref<8xf32, #tpu.memory_space<vmem>>
      %36 = tpu.memref_slice %arg8[%c1_i32_18] : memref<2x!tpu.dma_semaphore, #tpu.memory_space<semaphore_mem>> -> memref<1x!tpu.dma_semaphore, #tpu.memory_space<semaphore_mem>>
      %37 = tpu.memref_squeeze %36 : memref<1x!tpu.dma_semaphore, #tpu.memory_space<semaphore_mem>> -> memref<!tpu.dma_semaphore, #tpu.memory_space<semaphore_mem>>
      tpu.enqueue_dma source(%33 : memref<8xf32, #tpu.memory_space<any>>) target(%35 : memref<8xf32, #tpu.memory_space<vmem>>) target_semaphore(%37 : memref<!tpu.dma_semaphore, #tpu.memory_space<semaphore_mem>>)
    }
    %c8_i32_1 = arith.constant 8 : i32
    %c0_i32_2 = arith.constant 0 : i32
    %c8_i32_3 = arith.constant 8 : i32
    %2 = arith.addi %c0_i32_2, %c8_i32_3 : i32
    %c1_i32_4 = arith.constant 1 : i32
    scf.for %arg9 = %c0_i32_2 to %2 step %c1_i32_4  : i32 {
      %c0_i32_13 = arith.constant 0 : i32
      %c0_i32_14 = arith.constant 0 : i32
      %c0_i32_15 = arith.constant 0 : i32
      %c0_i32_16 = arith.constant 0 : i32
      %18 = tpu.memref_slice %arg3[%c0_i32_13, %c0_i32_16] : memref<32x8xf32, #tpu.memory_space<any>> -> memref<1x8xf32, #tpu.memory_space<any>>
      %19 = tpu.memref_squeeze %18 : memref<1x8xf32, #tpu.memory_space<any>> -> memref<8xf32, #tpu.memory_space<any>>
      %c0_i32_17 = arith.constant 0 : i32
      %20 = tpu.memref_slice %arg6[%c0_i32_14, %c0_i32_17] : memref<8x8xf32, #tpu.memory_space<vmem>> -> memref<1x8xf32, #tpu.memory_space<vmem>>
      %21 = tpu.memref_squeeze %20 : memref<1x8xf32, #tpu.memory_space<vmem>> -> memref<8xf32, #tpu.memory_space<vmem>>
      %22 = tpu.memref_slice %arg8[%c0_i32_15] : memref<2x!tpu.dma_semaphore, #tpu.memory_space<semaphore_mem>> -> memref<1x!tpu.dma_semaphore, #tpu.memory_space<semaphore_mem>>
      %23 = tpu.memref_squeeze %22 : memref<1x!tpu.dma_semaphore, #tpu.memory_space<semaphore_mem>> -> memref<!tpu.dma_semaphore, #tpu.memory_space<semaphore_mem>>
      tpu.wait_dma2 semaphore(%23 : memref<!tpu.dma_semaphore, #tpu.memory_space<semaphore_mem>>) src(%19 : memref<8xf32, #tpu.memory_space<any>>) dst(%21 : memref<8xf32, #tpu.memory_space<vmem>>)
      %c0_i32_18 = arith.constant 0 : i32
      %c0_i32_19 = arith.constant 0 : i32
      %c1_i32_20 = arith.constant 1 : i32
      %c0_i32_21 = arith.constant 0 : i32
      %24 = tpu.memref_slice %arg4[%c0_i32_18, %c0_i32_21] : memref<48x8xf32, #tpu.memory_space<any>> -> memref<1x8xf32, #tpu.memory_space<any>>
      %25 = tpu.memref_squeeze %24 : memref<1x8xf32, #tpu.memory_space<any>> -> memref<8xf32, #tpu.memory_space<any>>
      %c0_i32_22 = arith.constant 0 : i32
      %26 = tpu.memref_slice %arg7[%c0_i32_19, %c0_i32_22] : memref<8x8xf32, #tpu.memory_space<vmem>> -> memref<1x8xf32, #tpu.memory_space<vmem>>
      %27 = tpu.memref_squeeze %26 : memref<1x8xf32, #tpu.memory_space<vmem>> -> memref<8xf32, #tpu.memory_space<vmem>>
      %28 = tpu.memref_slice %arg8[%c1_i32_20] : memref<2x!tpu.dma_semaphore, #tpu.memory_space<semaphore_mem>> -> memref<1x!tpu.dma_semaphore, #tpu.memory_space<semaphore_mem>>
      %29 = tpu.memref_squeeze %28 : memref<1x!tpu.dma_semaphore, #tpu.memory_space<semaphore_mem>> -> memref<!tpu.dma_semaphore, #tpu.memory_space<semaphore_mem>>
      tpu.wait_dma2 semaphore(%29 : memref<!tpu.dma_semaphore, #tpu.memory_space<semaphore_mem>>) src(%25 : memref<8xf32, #tpu.memory_space<any>>) dst(%27 : memref<8xf32, #tpu.memory_space<vmem>>)
    }
    %c0 = arith.constant 0 : index
    %c0_5 = arith.constant 0 : index
    %3 = vector.load %arg6[%c0, %c0_5] : memref<8x8xf32, #tpu.memory_space<vmem>>, vector<8x8xf32>
    %c0_6 = arith.constant 0 : index
    %c0_7 = arith.constant 0 : index
    %4 = vector.load %arg7[%c0_6, %c0_7] : memref<8x8xf32, #tpu.memory_space<vmem>>, vector<8x8xf32>
    %5 = arith.mulf %3, %4 : vector<8x8xf32>
    %cst = arith.constant dense<0.000000e+00> : vector<8xf32>
    %6 = vector.multi_reduction <add>, %5, %cst [1] : vector<8x8xf32> to vector<8xf32>
    %7 = arith.negf %6 : vector<8xf32>
    %8 = math.exp %7 : vector<8xf32>
    %cst_8 = arith.constant 1.000000e+00 : f32
    %9 = vector.broadcast %cst_8 : f32 to vector<8xf32>
    %10 = arith.addf %9, %8 : vector<8xf32>
    %11 = arith.divf %9, %10 : vector<8xf32>
    %cst_9 = arith.constant 1.050000e+01 : f32
    %12 = vector.broadcast %cst_9 : f32 to vector<8xf32>
    %13 = arith.mulf %11, %12 : vector<8xf32>
    %cst_10 = arith.constant 0.000000e+00 : f32
    %14 = vector.broadcast %cst_10 : f32 to vector<8xf32>
    %15 = arith.addf %13, %14 : vector<8xf32>
    %16 = vector.shape_cast %15 : vector<8xf32> to vector<1x8xf32>
    %c0_11 = arith.constant 0 : index
    %c0_12 = arith.constant 0 : index
    %17 = vector.load %arg5[%c0_11, %c0_12] : memref<1x8xf32, #tpu.memory_space<vmem>>, vector<1x8xf32>
    tpu.vector_store %arg5[%c0_11, %c0_12], %16 {strides = array<i32>} : memref<1x8xf32, #tpu.memory_space<vmem>>, vector<1x8xf32>,
    return
  }
  func.func @transform_2(%arg0: i32, %arg1: memref<8xi32, #tpu.memory_space<smem>>, %arg2: memref<8xi32, #tpu.memory_space<smem>>) -> (i32, i32) {
    %c0_i32 = arith.constant 0 : i32
    %c0_i32_0 = arith.constant 0 : i32
    return %c0_i32, %arg0 : i32, i32
  }
}

</mosaic_0001>

<bundles_post_ra>
// kernel: tpu_custom_call.1
= control target key start
LH: loop header
LB: loop body
LE: loop exit
PB: predicated region body
PF: predicated region fallthrough
CT: control target
= control target key end

     0   :  { %s368_s0 = inlined_call_operand.vmem [shape: s32[8], index: 0, kind: input, shape index: {}]   ;;  %s369_s2 = inlined_call_operand.vmem [shape: f32[32,8], index: 2, kind: input, shape index: {}]   ;;  %s370_s3 = inlined_call_operand.vmem [shape: f32[48,8], index: 3, kind: input, shape index: {}]   ;;  %s371_s4 = inlined_call_operand.hbm [shape: f32[1,8], index: 4, kind: output, shape index: {}]   ;;  %s372_s1 = inlined_call_operand.vmem [shape: s32[8], index: 1, kind: input, shape index: {}]  }
   0x1   :  { %s9_s17 = sshll.u32 %s368_s0, 4  ;;  %s13_s20 = sshll.u32 %s372_s1, 4  ;;  %s10_s17 = int_to_ptr.vmem [resolvable:$true] %s9_s17  ;;  %s14_s20 = int_to_ptr.vmem [resolvable:$true] %s13_s20 }
   0x2   :  { %s246_s21 = scalar_lea.vmem %s10_s17, 16  ;;  %p251_p1 = scmp.lt.s32.totalorder %s10_s17, %s10_s17 }
   0x3   :  { %p247_p0 = scmp.ne.s32.totalorder %s10_s17, %s246_s21  ;;  %p252_p2 = scmp.lt.s32.totalorder %s246_s21, %s246_s21 }
   0x5   :  { %p253_p3 = por %p252_p2, %p251_p1 }
   0x7   :  { %p254_p4 = pnand %p253_p3, %p247_p0 }
   0x9   :  { %257 = shalt.err (!%p254_p4)  }
   0xa   :  { %s316_s22 = smov [#allocation6]   ;;  %s258_s23 = scalar_lea.vmem %s14_s20, 16 }
   0xb   :  { %12 = dma.vmem_to_smem %s10_s17, 16, %s316_s22, [#allocation5] }
   0xc   :  { %p259_p5 = scmp.ne.s32.totalorder %s14_s20, %s258_s23  ;;  %p263_p6 = scmp.lt.s32.totalorder %s14_s20, %s14_s20 }
   0xd   :  { %p264_p7 = scmp.lt.s32.totalorder %s258_s23, %s258_s23 }
   0xf   :  { %p265_p8 = por %p264_p7, %p263_p6 }
  0x11   :  { %p266_p9 = pnand %p265_p8, %p259_p5 }
  0x13   :  { %269 = shalt.err (!%p266_p9)  }
  0x14   :  { %s317_s0 = smov [#allocation7]  }
  0x15   :  { %16 = dma.vmem_to_smem %s14_s20, 16, %s317_s0, [#allocation5] }
  0x16   :  { %300 = dma.done.wait [#allocation5], 32 }
  0x17   :  { %301 = vsyncadd [#allocation5], 4294967264 }
  0x18   :  { %18 = sfence }
  0x19   :  { %19 = vsyncpa [#allocation9], 0  ;;  %s308_s1 = smov 0  }
  0x1a LB: > { %s28_s24 = sld [smem:[#allocation6 + %s310_s1]]  ;;  %s31_s29 = scalar_lea.vmem [#allocation2], %s310_s1  ;;  %s310_s1 = sphi %s308_s1, %s26_s1  }
  0x1b   : > { %s29_s25 = sld [smem:[#allocation7 + %s310_s1]] }
  0x20   : > { %s30_s28 = scalar_lea.vmem %s369_s2, %s28_s24 }
  0x21   : > { %v49_v0 = vld [vmem:[%s30_s28] sm:$0x1] }
  0x22   : > { %50 = vst [vmem:[%s31_s29] sm:$0x1] %v49_v0 }
  0x23   : > { %75 = vsyncadd [#allocation4], 16  ;;  %s76_s6 = scalar_lea.vmem %s370_s3, %s29_s25  ;;  %s77_s7 = scalar_lea.vmem [#allocation3], %s310_s1 }
  0x24   : > { %v96_v1 = vld [vmem:[%s76_s6] sm:$0x1] }
  0x25   : > { %97 = vst [vmem:[%s77_s7] sm:$0x1] %v96_v1 }
  0x26   : > { %122 = vsyncadd [#allocation4 + $0x1], 16  ;;  %s26_s1 = sadd.s32 1, %s310_s1  }
  0x27   : > { %p23_p10 = scmp.ge.s32.totalorder %s26_s1, 8  }
  0x28   :  { %s312_s8 = smov (%p23_p10), 0  }
  0x29   :  { %25 = sbr.rel (!%p23_p10) target bundleno = 26 (0x1a), region = 121 }
  0x30 LB: > { %302 = dma.done.wait [#allocation4], 16  ;;  %s314_s8 = sphi %s312_s8, %s128_s8  }
  0x31   : > { %303 = vsyncadd [#allocation4], 4294967280 }
  0x32   : > { %304 = dma.done.wait [#allocation4 + $0x1], 16 }
  0x33   : > { %305 = vsyncadd [#allocation4 + $0x1], 4294967280  ;;  %s128_s8 = sadd.s32 1, %s314_s8  }
  0x34   : > { %p125_p11 = scmp.ge.s32.totalorder %s128_s8, 8  }
  0x35   :  { %v134_v2 = vld [vmem:[#allocation2] sm:$0xff] (%p125_p11)  ;;  %v135_v3 = vld [vmem:[#allocation3] sm:$0xff] (%p125_p11)  ;;  %vm137_vm0 = vcmask (%p125_p11), 64512   ;;  %v150_v10 = vlaneseq (%p125_p11)  ;;  %s318_s2 = smov (%p125_p11), [#allocation8]   ;;  %vm157_vm1 = vcmask (%p125_p11), 57344  }
  0x36   :  { %127 = sbr.rel (!%p125_p11) target bundleno = 48 (0x30), region = 132  ;;  %v136_v4 = vmul.f32 (%p125_p11), %v135_v3, %v134_v2  ;;  %s165_s3 = sshll.u32 (%p125_p11), %s318_s2, 4  ;;  %s166_s3 = int_to_ptr.vmem [resolvable:$true] %s165_s3 }
  0x37   :  { %v151_v11 = vand.u32 (%p125_p11), 127, %v150_v10  ;;  %v153_v12 = vshrl.u32 (%p125_p11), %v150_v10, 7  ;;  %s270_s9 = scalar_lea.vmem (%p125_p11), %s166_s3, 16  ;;  %s274_s10 = scalar_lea.vmem (%p125_p11), %s166_s3, 32 }
  0x38   :  { %v138_v5 = vsel (%p125_p11), %vm137_vm0, %v136_v4, 0.0  ;;  %p271_p12 = scmp.ne.s32.totalorder (%p125_p11), %s166_s3, %s270_s9  ;;  %p275_p13 = scmp.lt.s32.totalorder (%p125_p11), %s166_s3, %s166_s3 }
  0x39   :  { %139 = vadd.xlane.f32.xlu0 (%p125_p11), %v138_v5  ;;  %v154_v13 = vsub.s32 (%p125_p11), %v151_v11, %v153_v12  ;;  %p276_p0 = scmp.lt.s32.totalorder (%p125_p11), %s274_s10, %s270_s9 }
  0x3b   :  { %p277_p1 = por (%p125_p11), %p276_p0, %p275_p13 }
  0x3d   :  { %p278_p2 = pnand %p277_p1, %p271_p12 }
  0xc6   :  { %v140_v6 = vpop.xlane.xlu0 %139 }
  0xc7   :  { %v220_v7 = vmul.f32 -1.442695, %v140_v6 }
  0xc9   :  { %242 = vpow2.f32 %v220_v7 }
  0xd3   :  { %v243_v8 = vpop.eup %242 }
  0xd4   :  { %v144_v9 = vadd.f32 1.0, %v243_v8 }
  0xd6   :  { %244 = vrcp.f32 %v144_v9 }
  0xe0   :  { %v245_v14 = vpop.eup %244 }
  0xe1   :  { %v147_v15 = vmul.f32 10.5, %v245_v14 }
  0xe3   :  { %v155_v16 = vrot.slane %v147_v15, %v154_v13 }
  0xe5   :  { %158 = vst.msk [vmem:[#allocation8] sm:$0x1] %vm157_vm1, %v155_v16 }
  0xe6   :  { %281 = shalt.err (!%p278_p2)
}
  0xe7   :  { %s282_s13 = scalar_lea.hbm %s371_s4, 16 }
  0xe8   :  { %p283_p3 = scmp.ne.s32.totalorder %s371_s4, %s282_s13  ;;  %p286_p4 = scmp.lt.u32.totalorder %s282_s13, %s371_s4 }
  0xea   :  { %p288_p5 = pnand %p286_p4, %p283_p3 }
  0xec   :  { %291 = shalt.err (!%p288_p5)
}
  0xed   :  { %168 = dma.vmem_to_hbm [thread:$0]  %s166_s3, 16, %s371_s4, [#allocation9]  }
  0xee   :  { %306 = dma.done.wait [#allocation9], 16  }
  0xef   :  { %307 = vsyncadd [#allocation9], 4294967280 }
  0xf0   :  { %172 = vsyncpa [#allocation9], 1 }
  0xf1   :  { %173 = vsyncmov [#allocation4] }
  0xf4   :  { %s174_s20 = vpop.sfrf %173 }
  0xf5   :  { %p221_p6 = scmp.ne.s32.totalorder %s174_s20, 0 }
  0xf7   :  { %178 = shalt.err (%p221_p6)  }
  0xf8   :  { %180 = vsyncmov [#allocation4 + $0x1] }
  0xfb   :  { %s181_s21 = vpop.sfrf %180 }
  0xfc   :  { %p222_p7 = scmp.ne.s32.totalorder %s181_s21, 0 }
  0xfe   :  { %185 = shalt.err (%p222_p7)  }

</bundles_post_ra>
